<compile_context>
chip_gen: v7x
topology: tpu7x:2x2x1
jax: 0.10.0
libtpu: 0.0.40
codegen_flags: <defaults>
</compile_context>

<pallas_src>
import functools
import jax
import jax.numpy as jnp
from jax import lax
from jax.experimental import pallas as pl
from jax.experimental.pallas import tpu as pltpu

LN_EPS = 1e-5
_INV_SQRT2 = 0.7071067811865476


def _layernorm(x, gamma, beta):
    # f32 VPU math, biased variance (matches nn.LayerNorm).
    mu = jnp.mean(x, axis=-1, keepdims=True)
    var = jnp.mean((x - mu) ** 2, axis=-1, keepdims=True)
    return (x - mu) * lax.rsqrt(var + LN_EPS) * gamma + beta


def vit_block_kernel(x_ref,
                     g1_ref, be1_ref,
                     wqkv_ref, bqkv_ref,
                     g2_ref, be2_ref,
                     w1_ref, b1_ref, w2_ref, b2_ref,
                     o_ref,
                     *, n_heads, d_head):
    f32 = jnp.float32
    H, dh = n_heads, d_head
    mm = wqkv_ref.dtype                           # matmul operand dtype (bf16 or f32)

    x = x_ref[0].astype(f32)                      # (S, D)
    S, D = x.shape

    # ---- LayerNorm 1 ----
    xn = _layernorm(x, g1_ref[...], be1_ref[...])                       # (S, D) f32

    # ---- MSA: all heads in one batched MXU stream ----
    # Single head-major relayout (reshape + one transpose) instead of H masked lane slices.
    xh = jnp.swapaxes(xn.astype(mm).reshape(S, H, dh), 0, 1)            # (H, S, dh)

    # Fused Q|K|V projection; weights already (in, out); 1/sqrt(dh) is pre-folded into Q cols/bias.
    qkv = jnp.einsum("hsd,hde->hse", xh, wqkv_ref[...],
                     preferred_element_type=f32) + bqkv_ref[...]        # (H, S, 3dh) f32
    q = qkv[:, :, 0 * dh:1 * dh]
    k = qkv[:, :, 1 * dh:2 * dh]
    v = qkv[:, :, 2 * dh:3 * dh]

    # Scaled scores (scale already folded into q), max-subtracted softmax, EUP approx reciprocal.
    s = jnp.einsum("hqd,hkd->hqk", q.astype(mm), k.astype(mm),
                   preferred_element_type=f32)                          # (H, S, S) f32
    s = s - jnp.max(s, axis=-1, keepdims=True)
    p = jnp.exp(s)                                                      # EUP
    inv = pl.reciprocal(jnp.sum(p, axis=-1, keepdims=True), approx=True)
    attn = p * inv
    ctx = jnp.einsum("hqk,hkd->hqd", attn.astype(mm), v.astype(mm),
                     preferred_element_type=f32)                        # (H, S, dh) f32

    # Residual 1 entirely in vregs: one relayout back to (S, D), no VMEM scratch round-trip.
    y = x + jnp.swapaxes(ctx, 0, 1).reshape(S, D)                       # (S, D) f32

    # ---- LayerNorm 2 ----
    yn = _layernorm(y, g2_ref[...], be2_ref[...])

    # ---- MLP: (S,D)@(D,4D) -> exact-erf GELU (torch nn.GELU parity) -> (S,4D)@(4D,D) ----
    h1 = jnp.dot(yn.astype(mm), w1_ref[...], preferred_element_type=f32) + b1_ref[...]
    h1 = 0.5 * h1 * (1.0 + lax.erf(h1 * _INV_SQRT2))
    h2 = jnp.dot(h1.astype(mm), w2_ref[...], preferred_element_type=f32) + b2_ref[...]

    o_ref[0] = (y + h2).astype(o_ref.dtype)                             # residual 2


def vit_block(x, params, *, n_heads, matmul_dtype=jnp.bfloat16):
    B, S, D = x.shape
    assert D % n_heads == 0
    d_head = D // n_heads
    (g1, be1, wq, bq, wk, bk, wv, bv, g2, be2, w1, b1, w2, b2) = params
    f32 = jnp.float32
    scale = 1.0 / (float(d_head) ** 0.5)

    # ---- host-side weight prep (constant across the grid, done once) ----
    # Fuse per-head Q|K|V, pre-transpose every matrix to (in, out) layout, and fold the softmax
    # scale into the Q weights AND bias so the kernel never scales the (H,S,S) score tensor.
    wqkv = jnp.concatenate([jnp.swapaxes(wq, -1, -2) * scale,
                            jnp.swapaxes(wk, -1, -2),
                            jnp.swapaxes(wv, -1, -2)], axis=-1).astype(matmul_dtype)   # (H, dh, 3dh)
    bqkv = jnp.concatenate([bq * scale, bk, bv], axis=-1).astype(f32)                  # (H, 1, 3dh)
    w1t = jnp.swapaxes(w1, 0, 1).astype(matmul_dtype)                                  # (D, 4D)
    w2t = jnp.swapaxes(w2, 0, 1).astype(matmul_dtype)                                  # (4D, D)
    ops = (g1.astype(f32), be1.astype(f32), wqkv, bqkv,
           g2.astype(f32), be2.astype(f32),
           w1t, b1.astype(f32), w2t, b2.astype(f32))

    # Constant-index weights: DMA'd once, single-buffered (halves weight VMEM; key on v7x's 64 MiB).
    def wspec(a):
        return pl.BlockSpec(a.shape, lambda b: (0,) * a.ndim, pipeline_mode=pl.Buffered(1))

    # Explicit VMEM budget: 1x single-buffered weights + 2x double-buffered I/O blocks
    # + f32 in-kernel temporaries (qkv, scores/probs, h1, LN/residual slabs) + headroom,
    # capped at 48 MiB so it fits inside v7x's 64 MiB per-TC VMEM with compiler scratch to spare.
    H = n_heads
    w_bytes = sum(int(a.size) * a.dtype.itemsize for a in ops)
    io_bytes = 2 * 2 * S * D * x.dtype.itemsize
    tmp_bytes = 4 * (H * S * 3 * d_head + 2 * H * S * S + S * 4 * D + 4 * S * D)
    vmem_bytes = int(min(max(w_bytes + io_bytes + 2 * tmp_bytes, 16 << 20), 48 << 20))

    kernel = functools.partial(vit_block_kernel, n_heads=n_heads, d_head=d_head)
    return pl.pallas_call(
        kernel,
        out_shape=jax.ShapeDtypeStruct((B, S, D), x.dtype),
        grid_spec=pltpu.PrefetchScalarGridSpec(
            num_scalar_prefetch=0,
            grid=(B,),
            in_specs=[pl.BlockSpec((1, S, D), lambda b: (b, 0, 0))]
                     + [wspec(a) for a in ops],
            out_specs=pl.BlockSpec((1, S, D), lambda b: (b, 0, 0)),
        ),
        compiler_params=pltpu.CompilerParams(
            dimension_semantics=("parallel",),
            vmem_limit_bytes=vmem_bytes),
    )(x, *ops)


# ---------------- pure-JAX reference (PyTorch semantics) ----------------
def vit_block_ref(x, params, *, n_heads):
    (g1, be1, wq, bq, wk, bk, wv, bv, g2, be2, w1, b1, w2, b2) = params
    D = x.shape[-1]
    dh = D // n_heads

    def ln(v, g, b):
        mu = v.mean(-1, keepdims=True)
        var = ((v - mu) ** 2).mean(-1, keepdims=True)
        return (v - mu) / jnp.sqrt(var + LN_EPS) * g + b

    xn = ln(x, g1, be1)
    outs = []
    for h in range(n_heads):
        seq = xn[:, :, h * dh:(h + 1) * dh]
        q = seq @ wq[h].T + bq[h]
        k = seq @ wk[h].T + bk[h]
        v = seq @ wv[h].T + bv[h]
        a = jax.nn.softmax(jnp.einsum("bqd,bkd->bqk", q, k) / dh ** 0.5, axis=-1)
        outs.append(jnp.einsum("bqk,bkd->bqd", a, v))
    y = x + jnp.concatenate(outs, axis=-1)
    yn = ln(y, g2, be2)
    h1 = jax.nn.gelu(yn @ w1.T + b1, approximate=False)
    return y + (h1 @ w2.T + b2)


def make_params(key, D, n_heads, mlp_ratio=4):
    dh = D // n_heads
    ks = jax.random.split(key, 12)
    f32 = jnp.float32
    g1 = jnp.ones((1, D), f32)
    be1 = jnp.zeros((1, D), f32)
    wq = jax.random.normal(ks[0], (n_heads, dh, dh), f32) * 0.1
    bq = jax.random.normal(ks[1], (n_heads, 1, dh), f32) * 0.1
    wk = jax.random.normal(ks[2], (n_heads, dh, dh), f32) * 0.1
    bk = jax.random.normal(ks[3], (n_heads, 1, dh), f32) * 0.1
    wv = jax.random.normal(ks[4], (n_heads, dh, dh), f32) * 0.1
    bv = jax.random.normal(ks[5], (n_heads, 1, dh), f32) * 0.1
    g2 = jnp.ones((1, D), f32)
    be2 = jnp.zeros((1, D), f32)
    w1 = jax.random.normal(ks[6], (mlp_ratio * D, D), f32) * 0.1
    b1 = jax.random.normal(ks[7], (1, mlp_ratio * D), f32) * 0.1
    w2 = jax.random.normal(ks[8], (D, mlp_ratio * D), f32) * 0.1
    b2 = jax.random.normal(ks[9], (1, D), f32) * 0.1
    return (g1, be1, wq, bq, wk, bk, wv, bv, g2, be2, w1, b1, w2, b2)


if __name__ == "__main__":
    B, S, D, H = 2, 8, 32, 2
    key = jax.random.PRNGKey(0)
    kx, kp = jax.random.split(key)
    x = jax.random.normal(kx, (B, S, D), jnp.float32)
    params = make_params(kp, D, H)

    ref = vit_block_ref(x, params, n_heads=H)

    # Default path: bf16 matmul operands, f32 accumulation (native MXU mode).
    out = jax.block_until_ready(vit_block(x, params, n_heads=H))
    assert out.shape == (B, S, D)
    assert jnp.allclose(out, ref, atol=1e-1, rtol=1e-1), \
        f"bf16 max err {jnp.max(jnp.abs(out - ref))}"

    # f32 matmul operands: tight check against the pure-JAX reference.
    out_f32 = jax.block_until_ready(vit_block(x, params, n_heads=H, matmul_dtype=jnp.float32))
    assert jnp.allclose(out_f32, ref, atol=1e-2, rtol=1e-2), \
        f"f32 max err {jnp.max(jnp.abs(out_f32 - ref))}"

    print("KERNEL_OK")
</pallas_src>

<mosaic_0001>
module attributes {stable_mosaic.version = 11 : i64} {
  func.func @vit_block_kernel(%arg0: i32, %arg1: memref<1x8x32xf32, #tpu.memory_space<vmem>>, %arg2: memref<1x32xf32, #tpu.memory_space<vmem>>, %arg3: memref<1x32xf32, #tpu.memory_space<vmem>>, %arg4: memref<2x16x48xbf16, #tpu.memory_space<vmem>>, %arg5: memref<2x1x48xf32, #tpu.memory_space<vmem>>, %arg6: memref<1x32xf32, #tpu.memory_space<vmem>>, %arg7: memref<1x32xf32, #tpu.memory_space<vmem>>, %arg8: memref<32x128xbf16, #tpu.memory_space<vmem>>, %arg9: memref<1x128xf32, #tpu.memory_space<vmem>>, %arg10: memref<128x32xbf16, #tpu.memory_space<vmem>>, %arg11: memref<1x32xf32, #tpu.memory_space<vmem>>, %arg12: memref<1x8x32xf32, #tpu.memory_space<vmem>>) attributes {dimension_semantics = [#tpu.dimension_semantics<parallel>], iteration_bounds = array<i64: 2>, scalar_prefetch = 0 : i64, scratch_operands = 0 : i64, tpu.core_type = #tpu.core_type<tc>, window_params = [{transform_indices = @transform_0, window_bounds = array<i64: 1, 8, 32>}, {pipeline_mode = #tpu.pipeline_mode<synchronous>, transform_indices = @transform_1, window_bounds = array<i64: 1, 32>}, {pipeline_mode = #tpu.pipeline_mode<synchronous>, transform_indices = @transform_2, window_bounds = array<i64: 1, 32>}, {pipeline_mode = #tpu.pipeline_mode<synchronous>, transform_indices = @transform_3, window_bounds = array<i64: 2, 16, 48>}, {pipeline_mode = #tpu.pipeline_mode<synchronous>, transform_indices = @transform_4, window_bounds = array<i64: 2, 1, 48>}, {pipeline_mode = #tpu.pipeline_mode<synchronous>, transform_indices = @transform_5, window_bounds = array<i64: 1, 32>}, {pipeline_mode = #tpu.pipeline_mode<synchronous>, transform_indices = @transform_6, window_bounds = array<i64: 1, 32>}, {pipeline_mode = #tpu.pipeline_mode<synchronous>, transform_indices = @transform_7, window_bounds = array<i64: 32, 128>}, {pipeline_mode = #tpu.pipeline_mode<synchronous>, transform_indices = @transform_8, window_bounds = array<i64: 1, 128>}, {pipeline_mode = #tpu.pipeline_mode<synchronous>, transform_indices = @transform_9, window_bounds = array<i64: 128, 32>}, {pipeline_mode = #tpu.pipeline_mode<synchronous>, transform_indices = @transform_10, window_bounds = array<i64: 1, 32>}, {transform_indices = @transform_11, window_bounds = array<i64: 1, 8, 32>}]} {
    %c0 = arith.constant 0 : index
    %c0_0 = arith.constant 0 : index
    %c0_1 = arith.constant 0 : index
    %0 = vector.load %arg1[%c0, %c0_0, %c0_1] : memref<1x8x32xf32, #tpu.memory_space<vmem>>, vector<1x8x32xf32>
    %1 = vector.shape_cast %0 : vector<1x8x32xf32> to vector<8x32xf32>
    %c0_2 = arith.constant 0 : index
    %c0_3 = arith.constant 0 : index
    %2 = vector.load %arg2[%c0_2, %c0_3] : memref<1x32xf32, #tpu.memory_space<vmem>>, vector<1x32xf32>
    %c0_4 = arith.constant 0 : index
    %c0_5 = arith.constant 0 : index
    %3 = vector.load %arg3[%c0_4, %c0_5] : memref<1x32xf32, #tpu.memory_space<vmem>>, vector<1x32xf32>
    %cst = arith.constant dense<0.000000e+00> : vector<8xf32>
    %4 = vector.multi_reduction <add>, %1, %cst [1] : vector<8x32xf32> to vector<8xf32>
    %5 = vector.shape_cast %4 : vector<8xf32> to vector<8x1xf32>
    %cst_6 = arith.constant 3.200000e+01 : f32
    %6 = vector.broadcast %cst_6 : f32 to vector<8x1xf32>
    %7 = arith.divf %5, %6 : vector<8x1xf32>
    %8 = vector.broadcast %7 : vector<8x1xf32> to vector<8x32xf32>
    %9 = arith.subf %1, %8 : vector<8x32xf32>
    %10 = arith.mulf %9, %9 : vector<8x32xf32>
    %cst_7 = arith.constant dense<0.000000e+00> : vector<8xf32>
    %11 = vector.multi_reduction <add>, %10, %cst_7 [1] : vector<8x32xf32> to vector<8xf32>
    %12 = vector.shape_cast %11 : vector<8xf32> to vector<8x1xf32>
    %cst_8 = arith.constant 3.200000e+01 : f32
    %13 = vector.broadcast %cst_8 : f32 to vector<8x1xf32>
    %14 = arith.divf %12, %13 : vector<8x1xf32>
    %15 = vector.broadcast %7 : vector<8x1xf32> to vector<8x32xf32>
    %16 = arith.subf %1, %15 : vector<8x32xf32>
    %cst_9 = arith.constant 9.99999974E-6 : f32
    %17 = vector.broadcast %cst_9 : f32 to vector<8x1xf32>
    %18 = arith.addf %14, %17 : vector<8x1xf32>
    %19 = math.rsqrt %18 : vector<8x1xf32>
    %20 = vector.broadcast %19 : vector<8x1xf32> to vector<8x32xf32>
    %21 = arith.mulf %16, %20 : vector<8x32xf32>
    %22 = vector.broadcast %2 : vector<1x32xf32> to vector<8x32xf32>
    %23 = arith.mulf %21, %22 : vector<8x32xf32>
    %24 = vector.broadcast %3 : vector<1x32xf32> to vector<8x32xf32>
    %25 = arith.addf %23, %24 : vector<8x32xf32>
    %26 = arith.truncf %25 : vector<8x32xf32> to vector<8x32xbf16>
    %27 = vector.shape_cast %26 : vector<8x32xbf16> to vector<8x2x16xbf16>
    %28 = tpu.transpose %27, [1, 0, 2] : vector<8x2x16xbf16> -> vector<2x8x16xbf16>
    %c0_10 = arith.constant 0 : index
    %c0_11 = arith.constant 0 : index
    %c0_12 = arith.constant 0 : index
    %29 = vector.load %arg4[%c0_10, %c0_11, %c0_12] : memref<2x16x48xbf16, #tpu.memory_space<vmem>>, vector<2x16x48xbf16>
    "tpu.trace_start"() <{level = 10 : i32, message = "hsd,hde->hse"}> : () -> ()
    %cst_13 = arith.constant dense<0.000000e+00> : vector<2x8x48xf32>
    %30 = tpu.matmul %28, %29, %cst_13 {dimension_numbers = #tpu.dot_dimension_numbers<[2], [1], [1], [2], [0, 0, 0, 1, 1, 2], [0], [0]>} : vector<2x8x16xbf16>, vector<2x16x48xbf16>, vector<2x8x48xf32> -> vector<2x8x48xf32>
    "tpu.trace_stop"() : () -> ()
    %c0_14 = arith.constant 0 : index
    %c0_15 = arith.constant 0 : index
    %c0_16 = arith.constant 0 : index
    %31 = vector.load %arg5[%c0_14, %c0_15, %c0_16] : memref<2x1x48xf32, #tpu.memory_space<vmem>>, vector<2x1x48xf32>
    %32 = vector.broadcast %31 : vector<2x1x48xf32> to vector<2x8x48xf32>
    %33 = arith.addf %30, %32 : vector<2x8x48xf32>
    %34 = vector.extract_strided_slice %33 {offsets = [0, 0, 0], sizes = [2, 8, 16], strides = [1, 1, 1]} : vector<2x8x48xf32> to vector<2x8x16xf32>
    %35 = vector.extract_strided_slice %33 {offsets = [0, 0, 16], sizes = [2, 8, 16], strides = [1, 1, 1]} : vector<2x8x48xf32> to vector<2x8x16xf32>
    %36 = vector.extract_strided_slice %33 {offsets = [0, 0, 32], sizes = [2, 8, 16], strides = [1, 1, 1]} : vector<2x8x48xf32> to vector<2x8x16xf32>
    %37 = arith.truncf %34 : vector<2x8x16xf32> to vector<2x8x16xbf16>
    %38 = arith.truncf %35 : vector<2x8x16xf32> to vector<2x8x16xbf16>
    "tpu.trace_start"() <{level = 10 : i32, message = "hqd,hkd->hqk"}> : () -> ()
    %cst_17 = arith.constant dense<0.000000e+00> : vector<2x8x8xf32>
    %39 = tpu.matmul %37, %38, %cst_17 {dimension_numbers = #tpu.dot_dimension_numbers<[2], [2], [1], [1], [0, 0, 0, 1, 1, 1], [0], [0]>} : vector<2x8x16xbf16>, vector<2x8x16xbf16>, vector<2x8x8xf32> -> vector<2x8x8xf32>
    "tpu.trace_stop"() : () -> ()
    %cst_18 = arith.constant dense<0xFF800000> : vector<2x8xf32>
    %40 = vector.multi_reduction <maximumf>, %39, %cst_18 [2] : vector<2x8x8xf32> to vector<2x8xf32>
    %41 = vector.shape_cast %40 : vector<2x8xf32> to vector<2x8x1xf32>
    %42 = vector.broadcast %41 : vector<2x8x1xf32> to vector<2x8x8xf32>
    %43 = arith.subf %39, %42 : vector<2x8x8xf32>
    %44 = math.exp %43 : vector<2x8x8xf32>
    %cst_19 = arith.constant dense<0.000000e+00> : vector<2x8xf32>
    %45 = vector.multi_reduction <add>, %44, %cst_19 [2] : vector<2x8x8xf32> to vector<2x8xf32>
    %46 = vector.shape_cast %45 : vector<2x8xf32> to vector<2x8x1xf32>
    %47 = tpu.reciprocal %46 {approx = true} : vector<2x8x1xf32> -> vector<2x8x1xf32>
    %48 = vector.broadcast %47 : vector<2x8x1xf32> to vector<2x8x8xf32>
    %49 = arith.mulf %44, %48 : vector<2x8x8xf32>
    %50 = arith.truncf %49 : vector<2x8x8xf32> to vector<2x8x8xbf16>
    %51 = arith.truncf %36 : vector<2x8x16xf32> to vector<2x8x16xbf16>
    "tpu.trace_start"() <{level = 10 : i32, message = "hqk,hkd->hqd"}> : () -> ()
    %cst_20 = arith.constant dense<0.000000e+00> : vector<2x8x16xf32>
    %52 = tpu.matmul %50, %51, %cst_20 {dimension_numbers = #tpu.dot_dimension_numbers<[2], [1], [1], [2], [0, 0, 0, 1, 1, 2], [0], [0]>} : vector<2x8x8xbf16>, vector<2x8x16xbf16>, vector<2x8x16xf32> -> vector<2x8x16xf32>
    "tpu.trace_stop"() : () -> ()
    %53 = tpu.transpose %52, [1, 0, 2] : vector<2x8x16xf32> -> vector<8x2x16xf32>
    %54 = vector.shape_cast %53 : vector<8x2x16xf32> to vector<8x32xf32>
    %55 = arith.addf %1, %54 : vector<8x32xf32>
    %c0_21 = arith.constant 0 : index
    %c0_22 = arith.constant 0 : index
    %56 = vector.load %arg6[%c0_21, %c0_22] : memref<1x32xf32, #tpu.memory_space<vmem>>, vector<1x32xf32>
    %c0_23 = arith.constant 0 : index
    %c0_24 = arith.constant 0 : index
    %57 = vector.load %arg7[%c0_23, %c0_24] : memref<1x32xf32, #tpu.memory_space<vmem>>, vector<1x32xf32>
    %cst_25 = arith.constant dense<0.000000e+00> : vector<8xf32>
    %58 = vector.multi_reduction <add>, %55, %cst_25 [1] : vector<8x32xf32> to vector<8xf32>
    %59 = vector.shape_cast %58 : vector<8xf32> to vector<8x1xf32>
    %cst_26 = arith.constant 3.200000e+01 : f32
    %60 = vector.broadcast %cst_26 : f32 to vector<8x1xf32>
    %61 = arith.divf %59, %60 : vector<8x1xf32>
    %62 = vector.broadcast %61 : vector<8x1xf32> to vector<8x32xf32>
    %63 = arith.subf %55, %62 : vector<8x32xf32>
    %64 = arith.mulf %63, %63 : vector<8x32xf32>
    %cst_27 = arith.constant dense<0.000000e+00> : vector<8xf32>
    %65 = vector.multi_reduction <add>, %64, %cst_27 [1] : vector<8x32xf32> to vector<8xf32>
    %66 = vector.shape_cast %65 : vector<8xf32> to vector<8x1xf32>
    %cst_28 = arith.constant 3.200000e+01 : f32
    %67 = vector.broadcast %cst_28 : f32 to vector<8x1xf32>
    %68 = arith.divf %66, %67 : vector<8x1xf32>
    %69 = vector.broadcast %61 : vector<8x1xf32> to vector<8x32xf32>
    %70 = arith.subf %55, %69 : vector<8x32xf32>
    %cst_29 = arith.constant 9.99999974E-6 : f32
    %71 = vector.broadcast %cst_29 : f32 to vector<8x1xf32>
    %72 = arith.addf %68, %71 : vector<8x1xf32>
    %73 = math.rsqrt %72 : vector<8x1xf32>
    %74 = vector.broadcast %73 : vector<8x1xf32> to vector<8x32xf32>
    %75 = arith.mulf %70, %74 : vector<8x32xf32>
    %76 = vector.broadcast %56 : vector<1x32xf32> to vector<8x32xf32>
    %77 = arith.mulf %75, %76 : vector<8x32xf32>
    %78 = vector.broadcast %57 : vector<1x32xf32> to vector<8x32xf32>
    %79 = arith.addf %77, %78 : vector<8x32xf32>
    %80 = arith.truncf %79 : vector<8x32xf32> to vector<8x32xbf16>
    %c0_30 = arith.constant 0 : index
    %c0_31 = arith.constant 0 : index
    %81 = vector.load %arg8[%c0_30, %c0_31] : memref<32x128xbf16, #tpu.memory_space<vmem>>, vector<32x128xbf16>
    %cst_32 = arith.constant dense<0.000000e+00> : vector<8x128xf32>
    %82 = tpu.matmul %80, %81, %cst_32 {dimension_numbers = #tpu.dot_dimension_numbers<[1], [0], [0], [1], [0, 0, 1, 1], [], []>} : vector<8x32xbf16>, vector<32x128xbf16>, vector<8x128xf32> -> vector<8x128xf32>
    %c0_33 = arith.constant 0 : index
    %c0_34 = arith.constant 0 : index
    %83 = vector.load %arg9[%c0_33, %c0_34] : memref<1x128xf32, #tpu.memory_space<vmem>>, vector<1x128xf32>
    %84 = vector.broadcast %83 : vector<1x128xf32> to vector<8x128xf32>
    %85 = arith.addf %82, %84 : vector<8x128xf32>
    %cst_35 = arith.constant 5.000000e-01 : f32
    %86 = vector.broadcast %cst_35 : f32 to vector<8x128xf32>
    %87 = arith.mulf %86, %85 : vector<8x128xf32>
    %cst_36 = arith.constant 0.707106769 : f32
    %88 = vector.broadcast %cst_36 : f32 to vector<8x128xf32>
    %89 = arith.mulf %85, %88 : vector<8x128xf32>
    %90 = math.erf %89 : vector<8x128xf32>
    %cst_37 = arith.constant 1.000000e+00 : f32
    %91 = vector.broadcast %cst_37 : f32 to vector<8x128xf32>
    %92 = arith.addf %91, %90 : vector<8x128xf32>
    %93 = arith.mulf %87, %92 : vector<8x128xf32>
    %94 = arith.truncf %93 : vector<8x128xf32> to vector<8x128xbf16>
    %c0_38 = arith.constant 0 : index
    %c0_39 = arith.constant 0 : index
    %95 = vector.load %arg10[%c0_38, %c0_39] : memref<128x32xbf16, #tpu.memory_space<vmem>>, vector<128x32xbf16>
    %cst_40 = arith.constant dense<0.000000e+00> : vector<8x32xf32>
    %96 = tpu.matmul %94, %95, %cst_40 {dimension_numbers = #tpu.dot_dimension_numbers<[1], [0], [0], [1], [0, 0, 1, 1], [], []>} : vector<8x128xbf16>, vector<128x32xbf16>, vector<8x32xf32> -> vector<8x32xf32>
    %c0_41 = arith.constant 0 : index
    %c0_42 = arith.constant 0 : index
    %97 = vector.load %arg11[%c0_41, %c0_42] : memref<1x32xf32, #tpu.memory_space<vmem>>, vector<1x32xf32>
    %98 = vector.broadcast %97 : vector<1x32xf32> to vector<8x32xf32>
    %99 = arith.addf %96, %98 : vector<8x32xf32>
    %100 = arith.addf %55, %99 : vector<8x32xf32>
    %c0_43 = arith.constant 0 : index
    %c0_44 = arith.constant 0 : index
    %c0_45 = arith.constant 0 : index
    %101 = vector.load %arg12[%c0_43, %c0_44, %c0_45] : memref<1x8x32xf32, #tpu.memory_space<vmem>>, vector<1x8x32xf32>
    %102 = vector.shape_cast %101 : vector<1x8x32xf32> to vector<8x32xf32>
    %103 = vector.shape_cast %100 : vector<8x32xf32> to vector<1x8x32xf32>
    tpu.vector_store %arg12[%c0_43, %c0_44, %c0_45], %103 {strides = array<i32>} : memref<1x8x32xf32, #tpu.memory_space<vmem>>, vector<1x8x32xf32>,
    return
  }
  func.func @transform_0(%arg0: i32) -> (i32, i32, i32) {
    %c0_i32 = arith.constant 0 : i32
    %c0_i32_0 = arith.constant 0 : i32
    %c0_i32_1 = arith.constant 0 : i32
    return %arg0, %c0_i32, %c0_i32_0 : i32, i32, i32
  }
  func.func @transform_1(%arg0: i32) -> (i32, i32) {
    %c0_i32 = arith.constant 0 : i32
    %c0_i32_0 = arith.constant 0 : i32
    %c0_i32_1 = arith.constant 0 : i32
    return %c0_i32, %c0_i32_0 : i32, i32
  }
  func.func @transform_2(%arg0: i32) -> (i32, i32) {
    %c0_i32 = arith.constant 0 : i32
    %c0_i32_0 = arith.constant 0 : i32
    %c0_i32_1 = arith.constant 0 : i32
    return %c0_i32, %c0_i32_0 : i32, i32
  }
  func.func @transform_3(%arg0: i32) -> (i32, i32, i32) {
    %c0_i32 = arith.constant 0 : i32
    %c0_i32_0 = arith.constant 0 : i32
    %c0_i32_1 = arith.constant 0 : i32
    %c0_i32_2 = arith.constant 0 : i32
    return %c0_i32, %c0_i32_0, %c0_i32_1 : i32, i32, i32
  }
  func.func @transform_4(%arg0: i32) -> (i32, i32, i32) {
    %c0_i32 = arith.constant 0 : i32
    %c0_i32_0 = arith.constant 0 : i32
    %c0_i32_1 = arith.constant 0 : i32
    %c0_i32_2 = arith.constant 0 : i32
    return %c0_i32, %c0_i32_0, %c0_i32_1 : i32, i32, i32
  }
  func.func @transform_5(%arg0: i32) -> (i32, i32) {
    %c0_i32 = arith.constant 0 : i32
    %c0_i32_0 = arith.constant 0 : i32
    %c0_i32_1 = arith.constant 0 : i32
    return %c0_i32, %c0_i32_0 : i32, i32
  }
  func.func @transform_6(%arg0: i32) -> (i32, i32) {
    %c0_i32 = arith.constant 0 : i32
    %c0_i32_0 = arith.constant 0 : i32
    %c0_i32_1 = arith.constant 0 : i32
    return %c0_i32, %c0_i32_0 : i32, i32
  }
  func.func @transform_7(%arg0: i32) -> (i32, i32) {
    %c0_i32 = arith.constant 0 : i32
    %c0_i32_0 = arith.constant 0 : i32
    %c0_i32_1 = arith.constant 0 : i32
    return %c0_i32, %c0_i32_0 : i32, i32
  }
  func.func @transform_8(%arg0: i32) -> (i32, i32) {
    %c0_i32 = arith.constant 0 : i32
    %c0_i32_0 = arith.constant 0 : i32
    %c0_i32_1 = arith.constant 0 : i32
    return %c0_i32, %c0_i32_0 : i32, i32
  }
  func.func @transform_9(%arg0: i32) -> (i32, i32) {
    %c0_i32 = arith.constant 0 : i32
    %c0_i32_0 = arith.constant 0 : i32
    %c0_i32_1 = arith.constant 0 : i32
    return %c0_i32, %c0_i32_0 : i32, i32
  }
  func.func @transform_10(%arg0: i32) -> (i32, i32) {
    %c0_i32 = arith.constant 0 : i32
    %c0_i32_0 = arith.constant 0 : i32
    %c0_i32_1 = arith.constant 0 : i32
    return %c0_i32, %c0_i32_0 : i32, i32
  }
  func.func @transform_11(%arg0: i32) -> (i32, i32, i32) {
    %c0_i32 = arith.constant 0 : i32
    %c0_i32_0 = arith.constant 0 : i32
    %c0_i32_1 = arith.constant 0 : i32
    return %arg0, %c0_i32, %c0_i32_0 : i32, i32, i32
  }
}

</mosaic_0001>

<bundles_post_ra>
// kernel: tpu_custom_call.1
= control target key start
LH: loop header
LB: loop body
LE: loop exit
PB: predicated region body
PF: predicated region fallthrough
CT: control target
= control target key end

     0   :  { %s1894_s0 = inlined_call_operand.vmem [shape: f32[2,8,32], index: 0, kind: input, shape index: {}]   ;;  %s1895_s1 = inlined_call_operand.vmem [shape: f32[1,32], index: 1, kind: input, shape index: {}]   ;;  %s1896_s2 = inlined_call_operand.vmem [shape: f32[1,32], index: 2, kind: input, shape index: {}]   ;;  %s1897_s3 = inlined_call_operand.vmem [shape: bf16[2,16,48], index: 3, kind: input, shape index: {}]   ;;  %s1898_s4 = inlined_call_operand.vmem [shape: f32[2,1,48], index: 4, kind: input, shape index: {}]   ;;  %s1899_s5 = inlined_call_operand.vmem [shape: f32[1,32], index: 5, kind: input, shape index: {}]   ;;  %s1900_s6 = inlined_call_operand.vmem [shape: f32[1,32], index: 6, kind: input, shape index: {}]   ;;  %s1901_s7 = inlined_call_operand.vmem [shape: bf16[32,128], index: 7, kind: input, shape index: {}]   ;;  %s1902_s8 = inlined_call_operand.vmem [shape: f32[1,128], index: 8, kind: input, shape index: {}]   ;;  %s1903_s9 = inlined_call_operand.vmem [shape: bf16[128,32], index: 9, kind: input, shape index: {}]   ;;  %s1904_s10 = inlined_call_operand.vmem [shape: f32[1,32], index: 10, kind: input, shape index: {}]   ;;  %s1905_s11 = inlined_call_operand.hbm [shape: f32[2,8,32], index: 11, kind: output, shape index: {}]  }
   0x1   :  { %1906 = sst [smem:[#allocation5_spill]] %s1894_s0 }
   0x2   :  { %16 = vsyncpa [#allocation3], 0 }
   0x3   :  { %18 = vsyncpa [#allocation3 + $0x1], 0  ;;  %s1636_s17 = smov 0   ;;  %s1638_s18 = smov 0  }
   0x4   :  { %s1640_s19 = smov 0   ;;  %s1642_s20 = smov 0  }
   0x5 LB: > { %s1657_s21 = sadd.s32 4294967295, %s1565_s20   ;;  %s1303_s22 = sadd.s32 4294967294, %s1565_s20   ;;  %s1565_s20 = sphi %s1642_s20, %s1913_s20   ;;  %s1561_s19 = sphi %s1640_s19, %s1912_s19   ;;  %s1557_s18 = sphi %s1638_s18, %s1911_s18   ;;  %s1553_s17 = sphi %s1636_s17, %s1910_s17  }
   0x6   : > { %s1661_s23 = sadd.s32 1, %s1565_s20   ;;  %s267_s24 = sadd.s32 1, %s1561_s19 }
   0x7   : > { %s264_s25 = ssub.s32 %s1565_s20, %s1661_s23  ;;  %p277_p0 = scmp.ne.s32.totalorder %s1561_s19, %s1557_s18 }
   0x8   : > { %p265_p1 = scmp.eq.s32.totalorder %s264_s25, 0  ;;  %p278_p2 = scmp.eq.s32.totalorder %s1657_s21, 1 }
   0x9   : > { %p283_p3 = scmp.ne.s32.totalorder %s1557_s18, %s1553_s17  ;;  %p284_p4 = scmp.eq.s32.totalorder %s1303_s22, 1 }
   0xa   : > { %s1672_s26 = scalar_select %p265_p1, %s1561_s19, %s267_s24  }
   0xb   : > { %p1674_p5 = por %p278_p2, %p277_p0  ;;  %p1678_p6 = por %p284_p4, %p283_p3 }
   0xc   : > { %p1306_p7 = scmp.ge.s32.totalorder %s1565_s20, 1  ;;  %p339_p8 = scmp.lt.s32.totalorder %s1565_s20, 3 }
   0xe   : > { %p340_p9 = pnand %p1306_p7, %p339_p8 }
   0xf   : > { %p378_p10 = scmp.lt.s32.totalorder (!%p340_p9), %s1657_s21, 1  ;;  %vm386_vm0 = vcmask (!%p340_p9), 261120   ;;  %s1909_s0 = sld [smem:[#allocation5_spill]] (!%p340_p9)  ;;  %v1309_v11 = vld [vmem:[%s1895_s1] ss:$0 sm:$0xff] (!%p340_p9)  ;;  %v1478_v18 = vld [vmem:[%s1897_s3 + $0x8] sm:$0xff] (!%p340_p9)   ;;  %v422_v22 = vlaneseq (!%p340_p9) }
  0x10   : > { %343 = sbr.rel (%p340_p9) target bundleno = 2481 (0x9b1), region = 64  ;;  %v1310_v13 = vld [vmem:[%s1896_s2] ss:$0 sm:$0xff] (!%p340_p9)  ;;  %s1567_s25 = smov (!%p340_p9), 112   ;;  %v1568_v19 = vmov (!%p340_p9), 0.0   ;;  %vm1569_vm1 = vmmov (!%p340_p9), 0  }
  0x11   : > { %v1477_v17 = vld [vmem:[%s1897_s3] sm:$0xff] (!%p340_p9)   ;;  %1366 = vmatprep.subr.bf16.mxu0 (!%p340_p9), %v1568_v19  ;;  %1372 = vmatprep.subr.bf16.mxu1 (!%p340_p9), %v1568_v19  ;;  %v1570_v20 = vmov (!%p340_p9), 1983009808   ;;  %v423_v24 = vshrl.u32 (!%p340_p9), %v422_v22, 7  ;;  %v1571_v25 = vmov (!%p340_p9), 1934713408  }
  0x12   : > { %1367 = vmatpush3.bf16.msra.mxu0 (!%p340_p9), %v1477_v17  ;;  %1368 = vmatprep.mubr.msk.bf16.mxu0 (!%p340_p9), %vm1569_vm1, %v1568_v19  ;;  %v420_v21 = vunpack.c.l.s4 (!%p340_p9), %v1570_v20  ;;  %v428_v26 = vunpack.c.l.s4 (!%p340_p9), %v1571_v25  ;;  %v1572_v31 = vmov (!%p340_p9), 0   ;;  %vm578_vm2 = vcmask (!%p340_p9), 130048   ;;  %s1573_s24 = smov (!%p340_p9), 96   ;;  %s375_s16 = sand.u32 (!%p340_p9), 1, %s1557_s18  }
  0x13   : > { %1373 = vmatpush3.bf16.msra.mxu1 (!%p340_p9), %v1478_v18  ;;  %1374 = vmatprep.mubr.msk.bf16.mxu1 (!%p340_p9), %vm1569_vm1, %v1568_v19  ;;  %vm771_vm3 = vcmask (!%p340_p9), 64512   ;;  %vm801_vm4 = vcmask (!%p340_p9), 1043456   ;;  %s1307_s22 = sshll.u32 (!%p340_p9), %s375_s16, 3 }
  0x14   : > { %1378 = vmatprep.subr.bf16.mxu0 (!%p340_p9), %v1568_v19  ;;  %1396 = vmatprep.subr.bf16.mxu1 (!%p340_p9), %v1568_v19  ;;  %v421_v23 = vunpack.c.0.s8 (!%p340_p9), %v420_v21  ;;  %v429_v28 = vunpack.c.0.s8 (!%p340_p9), %v428_v26 }
  0x16   : > { %v1716_v27 = vsub.s32 (!%p340_p9), %v421_v23, %v423_v24  ;;  %v1719_v30 = vsub.s32 (!%p340_p9), %v429_v28, %v423_v24 }
  0x17   : > { %s379_s29 = scalar_select %p378_p10, %s1657_s21, 1 }
  0x19   : > { %s1308_s30 = sshll.u32 %s379_s29, 3  ;;  %s1339_s29 = sshll.u32 %s1657_s21, 7 }
  0x1a   : > { %s381_s14 = scalar_lea.vmem %s1909_s0, %s1308_s30  ;;  %s377_s30 = scalar_lea.vmem [#allocation2], %s1307_s22 }
  0x1b   : > { %v1689_v0 = vld [vmem:[%s381_s14] sm:$0xff]  ;;  %s1244_s12 = sshll.u32 %s377_s30, 4  ;;  %s1851_s15 = scalar_lea.hbm %s1905_s11, %s1339_s29  ;;  %s1853_s12 = int_to_ptr.vmem [resolvable:$true] %s1244_s12 }
  0x1c   : > { %v387_v1 = vsel %vm386_vm0, %v1689_v0, 0.0  ;;  %s1231_s21 = scalar_lea.sflag [#allocation3], %s375_s16  ;;  %s1503_s22 = scalar_lea.vmem %s1853_s12, 128 }
  0x1d   : > { %388 = vadd.xlane.f32.xlu0 %v387_v1  ;;  %p1504_p11 = scmp.ne.s32.totalorder %s1853_s12, %s1503_s22 }
  0x1f   : > { %p1505_p12 = pnand %p1504_p11, %p1674_p5 }
  0x21   : > { %p1506_p13 = pneg %p1505_p12 }
  0xaa   : > { %v389_v2 = vpop.xlane.xlu0 %388 }
  0xab   : > { %v391_v3 = vmul.f32 0.03125, %v389_v2 }
  0xad   : > { %v392_v4 = vsub.f32 %v1689_v0, %v391_v3 }
  0xaf   : > { %v393_v5 = vmul.f32 %v392_v4, %v392_v4 }
  0xb1   : > { %v394_v6 = vsel %vm386_vm0, %v393_v5, 0.0 }
  0xb2   : > { %395 = vadd.xlane.f32.xlu0 %v394_v6 }
 0x13f   : > { %v396_v7 = vpop.xlane.xlu0 %395 }
 0x140   : > { %v397_v8 = vmul.f32 0.03125, %v396_v7 }
 0x142   : > { %v398_v9 = vadd.f32 1e-05, %v397_v8 }
 0x144   : > { %1489 = vrsqrt.f32 %v398_v9 }
 0x14e   : > { %v1490_v10 = vpop.eup %1489 }
 0x14f   : > { %v400_v12 = vmul.f32 %v1490_v10, %v392_v4 }
 0x151   : > { %v407_v14 = vmul.f32 %v1309_v11, %v400_v12 }
 0x153   : > { %v414_v15 = vadd.f32 %v1310_v13, %v407_v14  ;;  %v1311_v13 = vld [vmem:[%s1898_s4] ss:$0 sm:$0xff] }
 0x155   : > { %v415_v16 = vpack.c.bf16 %v414_v15, %v414_v15  ;;  %v1312_v15 = vld [vmem:[%s1898_s4 + $0x1] ss:$0 sm:$0xff] }
 0x157   : > { %417 = vrot.lane.b32.xlu1 %v415_v16, %s1567_s25  ;;  %v425_v29 = vrot.slane %v415_v16, %v1716_v27 }
 0x159   : > { %v426_v32 = vcombine.high %v425_v29, %v1572_v31  ;;  %v433_v33 = vrot.slane %v425_v29, %v1719_v30 }
 0x15b   : > { %v440_v35 = vrot.slane %v426_v32, %v1719_v30  ;;  %v441_v37 = vcombine.high %v433_v33, %v1572_v31  ;;  %v472_v44 = vshrl.u32 %v433_v33, 16 }
 0x15d   : > { %v442_v40 = vcombine.high %v440_v35, %v1572_v31  ;;  %v480_v45 = vshrl.u32 %v441_v37, 16  ;;  %v488_v48 = vshrl.u32 %v440_v35, 16 }
 0x15f   : > { %v496_v52 = vshrl.u32 %v442_v40, 16 }
 0x1c9   : > { %v418_v34 = vpop.permute.xlu1 %417 }
 0x1ca   : > { %v450_v36 = vrot.slane %v418_v34, %v1716_v27 }
 0x1cc   : > { %v451_v38 = vcombine.high %v450_v36, %v1572_v31  ;;  %v458_v39 = vrot.slane %v450_v36, %v1719_v30 }
 0x1ce   : > { %v465_v41 = vrot.slane %v451_v38, %v1719_v30  ;;  %v466_v42 = vcombine.high %v458_v39, %v1572_v31  ;;  %v473_v43 = vshrl.u32 %v458_v39, 16  ;;  %v470_v49 = vpack.i.b16 %v458_v39, %v433_v33 }
 0x1d0   : > { %v467_v46 = vcombine.high %v465_v41, %v1572_v31  ;;  %v481_v47 = vshrl.u32 %v466_v42, 16  ;;  %v486_v50 = vpack.i.b16 %v465_v41, %v440_v35  ;;  %v489_v51 = vshrl.u32 %v465_v41, 16 }
 0x1d1   : > { %v478_v53 = vpack.i.b16 %v466_v42, %v441_v37  ;;  %v474_v56 = vpack.i.b16 %v473_v43, %v472_v44 }
 0x1d2   : > { %v494_v54 = vpack.i.b16 %v467_v46, %v442_v40  ;;  %v497_v55 = vshrl.u32 %v467_v46, 16  ;;  %v490_v57 = vpack.i.b16 %v489_v51, %v488_v48  ;;  %v500_v58 = vcombine.low %v470_v49, %v486_v50 }
 0x1d3   : > { %v482_v59 = vpack.i.b16 %v481_v47, %v480_v45 }
 0x1d4   : > { %v498_v60 = vpack.i.b16 %v497_v55, %v496_v52  ;;  %v508_v61 = vcombine.low %v478_v53, %v494_v54  ;;  %v524_v62 = vcombine.low %v474_v56, %v490_v57  ;;  %v507_v63 = vrot.slane %v500_v58, %v1716_v27 }
 0x1d6   : > { %v515_v1 = vrot.slane %v508_v61, %v1716_v27  ;;  %v532_v2 = vcombine.low %v482_v59, %v498_v60  ;;  %v531_v3 = vrot.slane %v524_v62, %v1716_v27 }
 0x1d8   : > { %v516_v4 = vcombine.low %v507_v63, %v515_v1  ;;  %v539_v5 = vrot.slane %v532_v2, %v1716_v27 }
 0x1da   : > { %v523_v6 = vrot.slane %v516_v4, %v1719_v30  ;;  %v540_v7 = vcombine.low %v531_v3, %v539_v5 }
 0x1dc   : > { %v547_v8 = vrot.slane %v540_v7, %v1719_v30  ;;  %v551_v10 = vshrl.u32 %v523_v6, 16 }
 0x1de   : > { %v550_v9 = vpack.i.b16 %v547_v8, %v523_v6  ;;  %v552_v11 = vshrl.u32 %v547_v8, 16 }
 0x1e0   : > { %1369 = vmatmul.mubr.msk.bf16.vlgmr.msra.gmra.mrb[0].mxu0 %vm578_vm2, %v550_v9  ;;  %v553_v12 = vpack.i.b16 %v552_v11, %v551_v10 }
 0x1e1   : > { %1380 = vmatprep.mubr.msk.bf16.mxu0 %vm1569_vm1, %v1568_v19 }
 0x1e2   : > { %1375 = vmatmul.mubr.msk.bf16.vlgmr.msra.gmra.mrb[0].mxu1 %vm578_vm2, %v553_v12 }
 0x1e3   : > { %1398 = vmatprep.mubr.msk.bf16.mxu1 %vm1569_vm1, %v1568_v19 }
 0x2b3   : > { %v616_v14 = vpop.f32.mrb[0].mxu0 }
 0x2b4   : > { %v617_v16 = vadd.f32 %v1311_v13, %v616_v14  ;;  %v1370_v17 = vpop.f32.mrb[1].mxu0 }
 0x2b5   : > { %v619_v18 = vpop.f32.mrb[2].mxu0  ;;  %v665_v20 = vpop.f32.mrb[0].mxu1 }
 0x2b6   : > { %v671_v21 = vpack.c.bf16 %v617_v16, %v617_v16  ;;  %v666_v22 = vadd.f32 %v1312_v15, %v665_v20  ;;  %v1371_v23 = vpop.f32.mrb[3].mxu0  ;;  %v1376_v24 = vpop.f32.mrb[1].mxu1 }
 0x2b7   : > { %v668_v25 = vpop.f32.mrb[2].mxu1 }
 0x2b8   : > { %v672_v26 = vpack.c.bf16 %v666_v22, %v666_v22  ;;  %v1377_v28 = vpop.f32.mrb[3].mxu1  ;;  %674 = vrot.lane.b32.xlu1 %v671_v21, %s1567_s25 }
 0x2ba   : > { %723 = vrot.lane.b32.xlu0 %v672_v26, %s1567_s25  ;;  %s1574_s25 = smov 16  }
 0x32a   : > { %v675_v29 = vpop.permute.xlu1 %674 }
 0x32b   : > { %v680_v31 = vsel %vm578_vm2, %v675_v29, 0 }
 0x32c   : > { %1379 = vmatpush3.bf16.xpose.msra.mxu0 %v680_v31  ;;  %v724_v32 = vpop.permute.xlu0 %723 }
 0x32d   : > { %1384 = vmatprep.subr.bf16.mxu0 %v1568_v19  ;;  %v729_v33 = vsel %vm578_vm2, %v724_v32, 0 }
 0x333   : > { %1381 = vmatmul.mubr.msk.bf16.vlgmr.msra.gmra.mrb[4].mxu0 %vm578_vm2, %v671_v21 }
 0x334   : > { %1385 = vmatpush3.bf16.xpose.msra.mxu0 %v729_v33  ;;  %1386 = vmatprep.mubr.msk.bf16.mxu0 %vm1569_vm1, %v1568_v19 }
 0x335   : > { %1390 = vmatprep.subr.bf16.mxu0 %v1568_v19 }
 0x33b   : > { %1387 = vmatmul.mubr.msk.bf16.vlgmr.msra.gmra.mrb[8].mxu0 %vm578_vm2, %v672_v26 }
 0x33c   : > { %1392 = vmatprep.mubr.msk.bf16.mxu0 %vm1569_vm1, %v1568_v19 }
 0x406   : > { %v716_v34 = vpop.f32.mrb[4].mxu0 }
 0x407   : > { %v1382_v35 = vpop.f32.mrb[5].mxu0  ;;  %v772_v36 = vsel %vm771_vm3, %v716_v34, -inf }
 0x408   : > { %773 = vmax.xlane.f32.xlu1 %v772_v36  ;;  %v719_v37 = vpop.f32.mrb[6].mxu0 }
 0x409   : > { %v1383_v38 = vpop.f32.mrb[7].mxu0 }
 0x40e   : > { %v765_v39 = vpop.f32.mrb[8].mxu0 }
 0x40f   : > { %v1388_v40 = vpop.f32.mrb[9].mxu0  ;;  %v775_v41 = vsel %vm771_vm3, %v765_v39, -inf }
 0x410   : > { %776 = vmax.xlane.f32.xlu0 %v775_v41  ;;  %v768_v42 = vpop.f32.mrb[10].mxu0 }
 0x411   : > { %v1389_v43 = vpop.f32.mrb[11].mxu0 }
 0x426   : > { %845 = vrot.lane.b32.xlu0 %v672_v26, %s1573_s24 }
 0x495   : > { %v774_v44 = vpop.xlane.xlu1 %773 }
 0x496   : > { %v778_v45 = vsub.f32 %v716_v34, %v774_v44 }
 0x498   : > { %v780_v46 = vmul.f32 1.442695, %v778_v45 }
 0x49a   : > { %1491 = vpow2.f32 %v780_v46 }
 0x49d   : > { %v777_v47 = vpop.xlane.xlu0 %776 }
 0x49e   : > { %v779_v48 = vsub.f32 %v765_v39, %v777_v47 }
 0x4a0   : > { %v782_v49 = vmul.f32 1.442695, %v779_v48 }
 0x4a1   : > { %v846_v50 = vpop.permute.xlu0 %845 }
 0x4a2   : > { %1493 = vpow2.f32 %v782_v49  ;;  %v851_v51 = vsel %vm801_vm4, %v846_v50, 0  ;;  %v1479_v49 = vld [vmem:[%s1901_s7] sm:$0xff]  }
 0x4a3   : > { %1397 = vmatpush3.bf16.msra.mxu1 %v851_v51  ;;  %v1481_v50 = vld [vmem:[%s1903_s9] sm:$0xff]   ;;  %v1482_v51 = vld [vmem:[%s1903_s9 + $0x8] sm:$0xff]  }
 0x4a4   : > { %v1492_v52 = vpop.eup %1491  ;;  %1410 = vmatprep.subr.bf16.mxu1 %v1568_v19 }
 0x4a5   : > { %v784_v53 = vsel %vm771_vm3, %v1492_v52, 0.0 }
 0x4a6   : > { %785 = vadd.xlane.f32.xlu1 %v784_v53 }
 0x4ac   : > { %v1494_v54 = vpop.eup %1493 }
 0x4ad   : > { %v787_v55 = vsel %vm771_vm3, %v1494_v54, 0.0 }
 0x4ae   : > { %788 = vadd.xlane.f32.xlu1 %v787_v55 }
 0x4bf   : > { %796 = vrot.lane.b32.xlu1 %v671_v21, %s1573_s24  ;;  %s1575_s24 = smov [#allocation2]  }
 0x533   : > { %v786_v56 = vpop.xlane.xlu1 %785 }
 0x534   : > { %1495 = vrcp.f32 %v786_v56 }
 0x53b   : > { %v789_v57 = vpop.xlane.xlu1 %788 }
 0x53c   : > { %1497 = vrcp.f32 %v789_v57  ;;  %v1323_v57 = vld [vmem:[%s1899_s5] ss:$0 sm:$0xff] }
 0x53e   : > { %v1496_v58 = vpop.eup %1495 }
 0x53f   : > { %v792_v59 = vmul.f32 %v1496_v58, %v1492_v52  ;;  %v797_v60 = vpop.permute.xlu1 %796  ;;  %v1483_v52 = vld [vmem:[%s1903_s9 + $0x10] sm:$0xff]  }
 0x540   : > { %v803_v61 = vsel %vm801_vm4, %v797_v60, 0 }
 0x541   : > { %1391 = vmatpush3.bf16.msra.mxu0 %v803_v61  ;;  %v794_v62 = vpack.c.bf16 %v792_v59, %v792_v59  ;;  %v1324_v59 = vld [vmem:[%s1900_s6] ss:$0 sm:$0xff] }
 0x542   : > { %1402 = vmatprep.subr.bf16.mxu0 %v1568_v19 }
 0x544   : > { %1393 = vmatmul.mubr.msk.bf16.vlgmr.msra.gmra.mrb[12].mxu0 %vm771_vm3, %v794_v62 }
 0x545   : > { %1406 = vmatprep.mubr.msk.bf16.mxu0 %vm1569_vm1, %v1568_v19  ;;  %1403 = vmatpush3.bf16.msra.mxu0 %v1479_v49 }
 0x546   : > { %v1498_v63 = vpop.eup %1497  ;;  %1404 = vmatprep.subr.bf16.mxu0 %v1568_v19 }
 0x547   : > { %v793_v1 = vmul.f32 %v1498_v63, %v1494_v54  ;;  %v1484_v63 = vld [vmem:[%s1903_s9 + $0x18] sm:$0xff]  }
 0x549   : > { %v795_v2 = vpack.c.bf16 %v793_v1, %v793_v1  ;;  %v1485_v1 = vld [vmem:[%s1903_s9 + $0x20] sm:$0xff]  }
 0x54b   : > { %1399 = vmatmul.mubr.msk.bf16.vlgmr.msra.gmra.mrb[4].mxu1 %vm771_vm3, %v795_v2  ;;  %v1486_v2 = vld [vmem:[%s1903_s9 + $0x28] sm:$0xff]  }
 0x54c   : > { %1426 = vmatprep.mubr.msk.bf16.mxu1 %vm1569_vm1, %v1568_v19  ;;  %1411 = vmatpush3.bf16.msra.mxu1 %v1481_v50 }
 0x54d   : > { %1412 = vmatprep.subr.bf16.mxu1 %v1568_v19 }
 0x550   : > { %1413 = vmatpush3.bf16.msra.mxu1 %v1482_v51 }
 0x551   : > { %1414 = vmatprep.subr.bf16.mxu1 %v1568_v19 }
 0x554   : > { %1415 = vmatpush3.bf16.msra.mxu1 %v1483_v52 }
 0x555   : > { %1416 = vmatprep.subr.bf16.mxu1 %v1568_v19 }
 0x558   : > { %1417 = vmatpush3.bf16.msra.mxu1 %v1484_v63 }
 0x559   : > { %1418 = vmatprep.subr.bf16.mxu1 %v1568_v19 }
 0x55c   : > { %1419 = vmatpush3.bf16.msra.mxu1 %v1485_v1 }
 0x55d   : > { %1420 = vmatprep.subr.bf16.mxu1 %v1568_v19 }
 0x560   : > { %1421 = vmatpush3.bf16.msra.mxu1 %v1486_v2 }
 0x561   : > { %1422 = vmatprep.subr.bf16.mxu1 %v1568_v19 }
 0x617   : > { %v839_v3 = vpop.f32.mrb[12].mxu0 }
 0x618   : > { %v1394_v4 = vpop.f32.mrb[13].mxu0  ;;  %v893_v7 = vcombine.high %v839_v3, %v1568_v19  ;;  %v900_v9 = vrot.slane %v839_v3, %v1716_v27  ;;  %v1487_v3 = vld [vmem:[%s1903_s9 + $0x30] sm:$0xff]  }
 0x619   : > { %v842_v5 = vpop.f32.mrb[14].mxu0  ;;  %1423 = vmatpush3.bf16.msra.mxu1 %v1487_v3  ;;  %v1488_v4 = vld [vmem:[%s1903_s9 + $0x38] sm:$0xff]  }
 0x61a   : > { %v1395_v6 = vpop.f32.mrb[15].mxu0  ;;  %v907_v14 = vrot.slane %v893_v7, %v1716_v27  ;;  %1424 = vmatprep.subr.bf16.mxu1 %v1568_v19  ;;  %v1325_v5 = vld [vmem:[%s1902_s8] ss:$0 sm:$0xff] }
 0x61d   : > { %1425 = vmatpush3.bf16.msra.mxu1 %v1488_v4 }
 0x61e   : > { %v887_v8 = vpop.f32.mrb[4].mxu1 }
 0x61f   : > { %v908_v10 = vcombine.high %v887_v8, %v1568_v19  ;;  %v915_v11 = vrot.slane %v887_v8, %v1716_v27  ;;  %v1400_v12 = vpop.f32.mrb[5].mxu1 }
 0x620   : > { %v890_v13 = vpop.f32.mrb[6].mxu1 }
 0x621   : > { %v922_v15 = vrot.slane %v908_v10, %v1716_v27  ;;  %v923_v16 = vcombine.low %v900_v9, %v915_v11  ;;  %v924_v17 = vcombine.high %v900_v9, %v915_v11  ;;  %v1401_v18 = vpop.f32.mrb[7].mxu1 }
 0x623   : > { %v931_v20 = vrot.slane %v923_v16, %v1719_v30  ;;  %v938_v21 = vrot.slane %v924_v17, %v1719_v30  ;;  %v939_v22 = vcombine.low %v907_v14, %v922_v15  ;;  %v940_v23 = vcombine.high %v907_v14, %v922_v15  ;;  %v1329_v16 = vld [vmem:[%s1904_s10] ss:$0 sm:$0xff] }
 0x625   : > { %v947_v24 = vrot.slane %v939_v22, %v1719_v30  ;;  %v954_v25 = vrot.slane %v940_v23, %v1719_v30  ;;  %v959_v26 = vcombine.low %v931_v20, %v938_v21  ;;  %v1321_v28 = vcombine.high %v931_v20, %v938_v21 }
 0x627   : > { %v966_v29 = vrot.slane %v959_v26, %v1716_v27  ;;  %v974_v31 = vrot.slane %v1321_v28, %v1716_v27  ;;  %v975_v32 = vcombine.low %v947_v24, %v954_v25  ;;  %v1322_v33 = vcombine.high %v947_v24, %v954_v25 }
 0x629   : > { %v982_v34 = vrot.slane %v975_v32, %v1716_v27  ;;  %v990_v35 = vrot.slane %v1322_v33, %v1716_v27  ;;  %v991_v36 = vcombine.low %v966_v29, %v974_v31 }
 0x62b   : > { %v999_v37 = vcombine.low %v982_v34, %v990_v35  ;;  %v998_v38 = vrot.slane %v991_v36, %v1719_v30 }
 0x62d   : > { %v1006_v39 = vrot.slane %v999_v37, %v1719_v30 }
 0x62f   : > { %v1008_v40 = vcombine.high %v998_v38, %v1006_v39  ;;  %v1007_v41 = vcombine.low %v998_v38, %v1006_v39 }
 0x631   : > { %1010 = vrot.lane.b32.xlu1 %v1008_v40, %s1574_s25  ;;  %s1507_s25 = sshll.u32 %s1575_s24, 4  ;;  %s1508_s25 = int_to_ptr.vmem [resolvable:$false] %s1507_s25 }
 0x632   : > { %s1509_s0 = scalar_lea.vmem %s1508_s25, 256  ;;  %p1510_p0 = scmp.lt.s32.totalorder %s1853_s12, %s1508_s25 }
 0x633   : > { %p1511_p1 = scmp.lt.s32.totalorder %s1509_s0, %s1503_s22 }
 0x635   : > { %p1512_p2 = por %p1511_p1, %p1510_p0 }
 0x637   : > { %p1513_p3 = pnand %p1512_p2, %p1506_p13 }
 0x6a3   : > { %v1011_v42 = vpop.permute.xlu1 %1010 }
 0x6a4   : > { %v1013_v43 = vsel %vm578_vm2, %v1007_v41, %v1011_v42 }
 0x6a5   : > { %v1788_v44 = vadd.f32 %v1013_v43, %v1689_v0  ;;  %v1480_v0 = vld [vmem:[%s1901_s7 + $0x8] sm:$0xff]  }
 0x6a6   : > { %1405 = vmatpush3.bf16.msra.mxu0 %v1480_v0 }
 0x6a7   : > { %v1017_v45 = vsel %vm386_vm0, %v1788_v44, 0.0 }
 0x6a8   : > { %1018 = vadd.xlane.f32.xlu1 %v1017_v45 }
 0x735   : > { %v1019_v27 = vpop.xlane.xlu1 %1018 }
 0x736   : > { %v1020_v46 = vmul.f32 0.03125, %v1019_v27 }
 0x738   : > { %v1021_v47 = vsub.f32 %v1788_v44, %v1020_v46 }
 0x73a   : > { %v1022_v48 = vmul.f32 %v1021_v47, %v1021_v47 }
 0x73c   : > { %v1023_v30 = vsel %vm386_vm0, %v1022_v48, 0.0 }
 0x73d   : > { %1024 = vadd.xlane.f32.xlu0 %v1023_v30 }
 0x7ca   : > { %v1025_v53 = vpop.xlane.xlu0 %1024 }
 0x7cb   : > { %v1026_v54 = vmul.f32 0.03125, %v1025_v53 }
 0x7cd   : > { %v1027_v55 = vadd.f32 1e-05, %v1026_v54 }
 0x7cf   : > { %1499 = vrsqrt.f32 %v1027_v55 }
 0x7d9   : > { %v1500_v56 = vpop.eup %1499 }
 0x7da   : > { %v1029_v58 = vmul.f32 %v1500_v56, %v1021_v47 }
 0x7dc   : > { %v1036_v60 = vmul.f32 %v1323_v57, %v1029_v58 }
 0x7de   : > { %v1043_v61 = vadd.f32 %v1324_v59, %v1036_v60 }
 0x7e0   : > { %v1044_v62 = vpack.c.bf16 %v1043_v61, %v1043_v61 }
 0x7e2   : > { %1407 = vmatmul.mubr.msk.bf16.vlgmr.msra.gmra.mrb[16].mxu0 %vm386_vm0, %v1044_v62 }
 0x8b5   : > { %v1105_v6 = vpop.f32.mrb[16].mxu0 }
 0x8b6   : > { %v1106_v7 = vadd.f32 %v1325_v5, %v1105_v6  ;;  %v1408_v8 = vpop.f32.mrb[17].mxu0 }
 0x8b7   : > { %v1108_v9 = vpop.f32.mrb[18].mxu0 }
 0x8b8   : > { %v1112_v10 = vmul.f32 0.70710677, %v1106_v7  ;;  %v1409_v11 = vpop.f32.mrb[19].mxu0  ;;  %v1111_v19 = vmul.f32 0.5, %v1106_v7 }
 0x8ba   : > { %1501 = verf.f32 %v1112_v10 }
 0x8c4   : > { %v1502_v12 = vpop.eup %1501 }
 0x8c5   : > { %v1114_v13 = vadd.f32 1.0, %v1502_v12 }
 0x8c7   : > { %v1115_v14 = vmul.f32 %v1114_v13, %v1111_v19 }
 0x8c9   : > { %v1116_v15 = vpack.c.bf16 %v1115_v14, %v1115_v14 }
 0x8cb   : > { %1427 = vmatmul.mubr.bf16.vlgmr.msra.gmra.mrb[8].mxu1 %v1116_v15 }
 0x99e   : > { %v1222_v17 = vpop.f32.mrb[8].mxu1 }
 0x99f   : > { %v1223_v18 = vadd.f32 %v1329_v16, %v1222_v17  ;;  %v1428_v20 = vpop.f32.mrb[9].mxu1 }
 0x9a0   : > { %v1225_v21 = vpop.f32.mrb[10].mxu1 }
 0x9a1   : > { %v1228_v22 = vadd.f32 %v1223_v18, %v1788_v44  ;;  %v1429_v23 = vpop.f32.mrb[11].mxu1 }
 0x9a3   : > { %1229 = vst.msk [vmem:[%s377_s30] sm:$0xff] %vm386_vm0, %v1228_v22 }
 0x9a4   : > { %1516 = shalt.err (!%p1513_p3)
}
 0x9a5   : > { %s1517_s16 = scalar_lea.hbm %s1851_s15, 128  ;;  %s1521_s13 = scalar_lea.hbm %s1905_s11, 256 }
 0x9a6   : > { %p1518_p4 = scmp.ne.s32.totalorder %s1851_s15, %s1517_s16  ;;  %p1522_p9 = scmp.lt.u32.totalorder %s1851_s15, %s1905_s11 }
 0x9a7   : > { %p1523_p10 = scmp.lt.u32.totalorder %s1521_s13, %s1517_s16  ;;  %p1525_p12 = scmp.lt.u32.totalorder %s1517_s16, %s1851_s15 }
 0x9a8   : > { %p1519_p7 = pnand %p1518_p4, %p1674_p5 }
 0x9a9   : > { %p1524_p11 = por %p1523_p10, %p1522_p9 }
 0x9aa   : > { %p1520_p8 = pneg %p1519_p7 }
 0x9ab   : > { %p1526_p13 = por %p1525_p12, %p1524_p11 }
 0x9ad   : > { %p1527_p0 = pnand %p1526_p13, %p1520_p8 }
 0x9af   : > { %1530 = shalt.err (!%p1527_p0)
}
 0x9b0   : > { %1430 = dma.vmem_to_hbm [thread:$0]  (%p1674_p5), %s1853_s12, 128, %s1851_s15, %s1231_s21  }
 0x9b1 PF: > { %p1436_p1 = scmp.ge.s32.totalorder %s1565_s20, 2  ;;  %s1256_s0 = sand.u32 1, %s1553_s17  }
 0x9b2   : > { %s1257_s22 = scalar_lea.sflag [#allocation3], %s1256_s0 }
 0x9b3   : > { %p1433_p2 = pnand %p1436_p1, %p1678_p6 }
 0x9b5   : > { %1548 = dma.done.wait (!%p1433_p2), %s1257_s22, 128  }
 0x9b6   : > { %1550 = vsyncadd (!%p1433_p2), %s1257_s22, 4294967168  ;;  %p21_p3 = scmp.ge.s32.totalorder %s1661_s23, 4   ;;  %s1910_s17 = smov %s1557_s18 }
 0x9b7   : > { %s1911_s18 = smov %s1561_s19  ;;  %s1912_s19 = smov %s1672_s26 }
 0x9b8   : > { %s1913_s20 = smov %s1661_s23  ;;  %23 = sbr.rel (!%p21_p3) target bundleno = 5 (0x5), region = 99 }
 0x9bf   :  { %1262 = vsyncpa [#allocation3], 1 }
 0x9c0   :  { %1264 = vsyncpa [#allocation3 + $0x1], 1 }

</bundles_post_ra>
